<compile_context>
chip_gen: v7x
topology: tpu7x:2x2x1
jax: 0.10.0
libtpu: 0.0.40
codegen_flags: <defaults>
</compile_context>

<pallas_src>
import jax
import jax.numpy as jnp
from jax import lax
from jax.experimental import pallas as pl
from jax.experimental.pallas import tpu as pltpu


def _round_up(x, m):
    return (x + m - 1) // m * m


def _vmem_limit_bytes():
    """~75% of physical per-core VMEM: ~48 MiB on v7x, ~96 MiB on v5e/v6e."""
    cap = 64 * 1024 * 1024
    try:
        cap = int(pltpu.get_tpu_info().vmem_capacity_bytes)
    except Exception:
        pass
    return int(cap * 3 // 4)


def _num_tensorcores():
    """Only v7x has 2 TensorCores per chip; v5e/v6e have 1."""
    try:
        kind = jax.devices()[0].device_kind.lower()
    except Exception:
        return 1
    return 2 if "v7" in kind else 1


def rnn_fused_kernel(x_ref, wih_ref, whh_ref, wfc_ref, b_ref, bfc_ref,
                     out_ref, h_ref, hs_ref):
    """Per time-chunk: x@Wih+b  ->  sequential h_t = tanh(. + h@Whh)  ->  FC.

    x_ref:   [Tc, Bb, Hp] bf16  gathered embeddings (time-major chunk)
    wih_ref: [Hp, Hp]     bf16  W_ih^T
    whh_ref: [Hp, Hp]     bf16  W_hh^T
    wfc_ref: [Hp, Lp]     bf16  W_fc^T
    b_ref:   [1, Hp]      f32   b_ih + b_hh
    bfc_ref: [1, Lp]      f32   b_fc
    out_ref: [Tc, Bb, Lp] f32   FC output chunk (lane-dense)
    h_ref:   [Bb, Hp]     f32   scratch: hidden-state carry across time chunks
    hs_ref:  [Tc, Bb, Hp] f32   scratch: staged input term, overwritten by h_t
    """
    # Reset the carried hidden state at the first time-chunk of each batch block.
    @pl.when(pl.program_id(1) == 0)
    def _():
        h_ref[...] = jnp.zeros_like(h_ref)

    tc, bb, hp = hs_ref.shape
    lp = out_ref.shape[-1]

    # Non-recurrent input projection for the whole chunk (Tc*Bb MXU rows),
    # staged in VMEM scratch; each slot is read once then overwritten with h_t.
    xw = jnp.dot(x_ref[...].reshape(tc * bb, hp), wih_ref[...],
                 preferred_element_type=jnp.float32)
    hs_ref[...] = xw.reshape(tc, bb, hp) + b_ref[...]

    def step(i, h):
        pre = hs_ref[i] + jnp.dot(h.astype(jnp.bfloat16), whh_ref[...],
                                  preferred_element_type=jnp.float32)
        h_new = jnp.tanh(pre)      # add + tanh stay f32 (no bf16 VPU/EUP on v5e)
        hs_ref[i] = h_new
        return h_new

    # Partial unroll: lets the LLO scheduler overlap tanh(t) with h@Whh of t+1
    # without blowing vreg / i-cache pressure for large time chunks.
    # TODO(synk): interleave two independent batch sub-blocks inside the step to
    # further hide EUP tanh latency behind the other sub-block's MXU matmul.
    h_ref[...] = lax.fori_loop(0, tc, step, h_ref[...], unroll=min(tc, 8))

    # Fused FC head: one [Tc*Bb, Hp] x [Hp, Lp] matmul per chunk instead of
    # writing hidden states to HBM and re-reading them with an XLA einsum.
    hs = hs_ref[...].reshape(tc * bb, hp).astype(jnp.bfloat16)
    out = jnp.dot(hs, wfc_ref[...], preferred_element_type=jnp.float32) + bfc_ref[...]
    out_ref[...] = out.reshape(tc, bb, lp)


def rnn_model_forward(x_ids, params, *, time_chunk=None):
    """Forward pass matching RNNModel.forward (dropout in eval mode = identity)."""
    emb = params["embedding"]                       # [V, H]
    H = emb.shape[1]
    L = params["w_fc"].shape[0]
    B, T = x_ids.shape

    Hp = _round_up(H, 128)                          # lane-dense hidden dim
    Lp = _round_up(L, 128)                          # lane-dense label dim
    Bp = _round_up(B, 8)                            # f32 sublane padding

    # Batch split across TensorCores only on v7x (2 TCs) and only when each
    # block keeps >=64 rows; on v5e/v6e a split is just a serial outer loop
    # that doubles grid overhead and halves MXU row occupancy.
    nb = 2 if (_num_tensorcores() == 2 and Bp % 16 == 0 and Bp // 2 >= 64) else 1
    Bb = Bp // nb

    vmem_limit = _vmem_limit_bytes()
    if time_chunk is None:
        # VMEM budget: single-buffered bf16 weights + biases + h carry (fixed),
        # plus per-timestep cost of the double-buffered bf16 input block, the
        # double-buffered f32 output block, the f32 hs scratch row and the
        # transient bf16 FC operand.
        weights = (2 * Hp * Hp + Hp * Lp) * 2 + (Hp + Lp) * 4
        fixed = weights + Bb * Hp * 4 + (4 << 20)   # + headroom
        per_t = Bb * (10 * Hp + 8 * Lp)
        time_chunk = max(8, min(128, (vmem_limit - fixed) // per_t))
    Tc = int(max(1, min(time_chunk, T)))
    Tp = _round_up(T, Tc)
    nt = Tp // Tc

    # Embedding gather directly in time-major order (padding_idx=0 row is zero),
    # zero-padded (T->Tp grid, B->Bp sublane, H->Hp lane) and cast to bf16 to
    # halve the kernel's streaming HBM read.
    x_tm = jnp.take(emb, x_ids.T, axis=0)                           # [T, B, H]
    x_tm = jnp.pad(x_tm, ((0, Tp - T), (0, Bp - B), (0, Hp - H)))
    x_tm = x_tm.astype(jnp.bfloat16)

    # Transposed, zero-padded, bf16 weights. Padding cannot leak: padded rows /
    # cols are zero and tanh(0)=0 keeps padded hidden lanes exactly 0.
    wih_t = jnp.pad(params["w_ih"].T, ((0, Hp - H), (0, Hp - H))).astype(jnp.bfloat16)
    whh_t = jnp.pad(params["w_hh"].T, ((0, Hp - H), (0, Hp - H))).astype(jnp.bfloat16)
    wfc_t = jnp.pad(params["w_fc"].T, ((0, Hp - H), (0, Lp - L))).astype(jnp.bfloat16)
    b_comb = jnp.pad(params["b_ih"] + params["b_hh"], (0, Hp - H)).reshape(1, Hp)
    bfc = jnp.pad(params["b_fc"], (0, Lp - L)).reshape(1, Lp)

    const = lambda b, t: (0, 0)
    weight_mode = pl.Buffered(1)     # constant block index -> no second buffer

    out_pad = pl.pallas_call(
        rnn_fused_kernel,
        out_shape=jax.ShapeDtypeStruct((Tp, Bp, Lp), jnp.float32),
        grid_spec=pltpu.PrefetchScalarGridSpec(
            num_scalar_prefetch=0,
            grid=(nb, nt),
            in_specs=[
                pl.BlockSpec((Tc, Bb, Hp), lambda b, t: (t, b, 0)),
                pl.BlockSpec((Hp, Hp), const, pipeline_mode=weight_mode),
                pl.BlockSpec((Hp, Hp), const, pipeline_mode=weight_mode),
                pl.BlockSpec((Hp, Lp), const, pipeline_mode=weight_mode),
                pl.BlockSpec((1, Hp), const, pipeline_mode=weight_mode),
                pl.BlockSpec((1, Lp), const, pipeline_mode=weight_mode),
            ],
            out_specs=pl.BlockSpec((Tc, Bb, Lp), lambda b, t: (t, b, 0)),
            scratch_shapes=[
                pltpu.VMEM((Bb, Hp), jnp.float32),       # h carry
                pltpu.VMEM((Tc, Bb, Hp), jnp.float32),   # staged xW_ih+b / h_t
            ],
        ),
        compiler_params=pltpu.CompilerParams(
            # Time axis must stay LAST and "arbitrary": the h carry depends on
            # it being the sequentially iterated innermost grid dimension.
            dimension_semantics=("parallel", "arbitrary"),
            vmem_limit_bytes=int(vmem_limit),
        ),
    )(x_tm, wih_t, whh_t, wfc_t, b_comb, bfc)

    # TODO(synk): nn.Dropout(p=0.3) is identity at inference; training-mode
    # stochastic masking is not reproduced here.
    # Strip padding; the remaining [T, B, L] -> [B, T, L] transpose is tiny.
    return jnp.transpose(out_pad[:T, :B, :L], (1, 0, 2))


def init_params(key, vocab_size, hidden_size, num_labels):
    ks = jax.random.split(key, 7)
    scale = 0.1
    emb = scale * jax.random.normal(ks[0], (vocab_size, hidden_size), jnp.float32)
    emb = emb.at[0].set(0.0)   # padding_idx=0
    return {
        "embedding": emb,
        "w_ih": scale * jax.random.normal(ks[1], (hidden_size, hidden_size), jnp.float32),
        "w_hh": scale * jax.random.normal(ks[2], (hidden_size, hidden_size), jnp.float32),
        "b_ih": scale * jax.random.normal(ks[3], (hidden_size,), jnp.float32),
        "b_hh": scale * jax.random.normal(ks[4], (hidden_size,), jnp.float32),
        "w_fc": scale * jax.random.normal(ks[5], (num_labels, hidden_size), jnp.float32),
        "b_fc": scale * jax.random.normal(ks[6], (num_labels,), jnp.float32),
    }


def reference_forward(x_ids, params):
    """Pure-JAX f32 reference replicating nn.Embedding -> nn.RNN(tanh) -> Linear."""
    emb = jnp.take(params["embedding"], x_ids, axis=0)   # [B, T, H]
    B, T, H = emb.shape

    def step(h, x_t):
        h_new = jnp.tanh(x_t @ params["w_ih"].T + params["b_ih"]
                         + h @ params["w_hh"].T + params["b_hh"])
        return h_new, h_new

    h0 = jnp.zeros((B, H), jnp.float32)
    _, hs = lax.scan(step, h0, jnp.transpose(emb, (1, 0, 2)))  # hs: [T, B, H]
    hs = jnp.transpose(hs, (1, 0, 2))                          # [B, T, H]
    return hs @ params["w_fc"].T + params["b_fc"]


if __name__ == "__main__":
    B, T = 2, 8          # batch, sequence length
    V, H, L = 16, 32, 8  # vocab_size, hidden_size, num_labels

    key = jax.random.PRNGKey(0)
    k_par, k_ids = jax.random.split(key)
    params = init_params(k_par, V, H, L)
    x_ids = jax.random.randint(k_ids, (B, T), 0, V, dtype=jnp.int32)

    out = rnn_model_forward(x_ids, params)
    out = jax.block_until_ready(out)

    ref = jax.block_until_ready(reference_forward(x_ids, params))
    assert out.shape == (B, T, L), out.shape
    # bf16 MXU operands with f32 accumulation -> relaxed tolerance vs f32 ref.
    assert jnp.allclose(out, ref, atol=2e-2, rtol=2e-2), \
        float(jnp.max(jnp.abs(out - ref)))

    print("KERNEL_OK")
</pallas_src>

<mosaic_0001>
module attributes {stable_mosaic.version = 11 : i64} {
  func.func @rnn_fused_kernel(%arg0: i32, %arg1: i32, %arg2: memref<8x8x128xbf16, #tpu.memory_space<vmem>>, %arg3: memref<128x128xbf16, #tpu.memory_space<vmem>>, %arg4: memref<128x128xbf16, #tpu.memory_space<vmem>>, %arg5: memref<128x128xbf16, #tpu.memory_space<vmem>>, %arg6: memref<1x128xf32, #tpu.memory_space<vmem>>, %arg7: memref<1x128xf32, #tpu.memory_space<vmem>>, %arg8: memref<8x8x128xf32, #tpu.memory_space<vmem>>, %arg9: memref<8x128xf32, #tpu.memory_space<vmem>>, %arg10: memref<8x8x128xf32, #tpu.memory_space<vmem>>) attributes {dimension_semantics = [#tpu.dimension_semantics<parallel>, #tpu.dimension_semantics<arbitrary>], iteration_bounds = array<i64: 1, 1>, scalar_prefetch = 0 : i64, scratch_operands = 2 : i64, tpu.core_type = #tpu.core_type<tc>, window_params = [{transform_indices = @transform_0, window_bounds = array<i64: 8, 8, 128>}, {pipeline_mode = #tpu.pipeline_mode<synchronous>, transform_indices = @transform_1, window_bounds = array<i64: 128, 128>}, {pipeline_mode = #tpu.pipeline_mode<synchronous>, transform_indices = @transform_2, window_bounds = array<i64: 128, 128>}, {pipeline_mode = #tpu.pipeline_mode<synchronous>, transform_indices = @transform_3, window_bounds = array<i64: 128, 128>}, {pipeline_mode = #tpu.pipeline_mode<synchronous>, transform_indices = @transform_4, window_bounds = array<i64: 1, 128>}, {pipeline_mode = #tpu.pipeline_mode<synchronous>, transform_indices = @transform_5, window_bounds = array<i64: 1, 128>}, {transform_indices = @transform_6, window_bounds = array<i64: 8, 8, 128>}]} {
    %c0_i32 = arith.constant 0 : i32
    %0 = arith.cmpi eq, %arg1, %c0_i32 : i32
    %1 = arith.extui %0 : i1 to i32
    %c0_i32_0 = arith.constant 0 : i32
    %2 = arith.cmpi ne, %1, %c0_i32_0 : i32
    scf.if %2 {
      %cst_82 = arith.constant 0.000000e+00 : f32
      %121 = vector.broadcast %cst_82 : f32 to vector<8x128xf32>
      %c0_83 = arith.constant 0 : index
      %c0_84 = arith.constant 0 : index
      %122 = vector.load %arg9[%c0_83, %c0_84] : memref<8x128xf32, #tpu.memory_space<vmem>>, vector<8x128xf32>
      tpu.vector_store %arg9[%c0_83, %c0_84], %121 {strides = array<i32>} : memref<8x128xf32, #tpu.memory_space<vmem>>, vector<8x128xf32>,
    } else {
    }
    %c0 = arith.constant 0 : index
    %c0_1 = arith.constant 0 : index
    %c0_2 = arith.constant 0 : index
    %3 = vector.load %arg2[%c0, %c0_1, %c0_2] : memref<8x8x128xbf16, #tpu.memory_space<vmem>>, vector<8x8x128xbf16>
    %4 = vector.shape_cast %3 : vector<8x8x128xbf16> to vector<64x128xbf16>
    %c0_3 = arith.constant 0 : index
    %c0_4 = arith.constant 0 : index
    %5 = vector.load %arg3[%c0_3, %c0_4] : memref<128x128xbf16, #tpu.memory_space<vmem>>, vector<128x128xbf16>
    %cst = arith.constant dense<0.000000e+00> : vector<64x128xf32>
    %6 = tpu.matmul %4, %5, %cst {dimension_numbers = #tpu.dot_dimension_numbers<[1], [0], [0], [1], [0, 0, 1, 1], [], []>} : vector<64x128xbf16>, vector<128x128xbf16>, vector<64x128xf32> -> vector<64x128xf32>
    %7 = vector.shape_cast %6 : vector<64x128xf32> to vector<8x8x128xf32>
    %c0_5 = arith.constant 0 : index
    %c0_6 = arith.constant 0 : index
    %8 = vector.load %arg6[%c0_5, %c0_6] : memref<1x128xf32, #tpu.memory_space<vmem>>, vector<1x128xf32>
    %9 = vector.shape_cast %8 : vector<1x128xf32> to vector<1x1x128xf32>
    %10 = vector.broadcast %9 : vector<1x1x128xf32> to vector<8x8x128xf32>
    %11 = arith.addf %7, %10 : vector<8x8x128xf32>
    %c0_7 = arith.constant 0 : index
    %c0_8 = arith.constant 0 : index
    %c0_9 = arith.constant 0 : index
    %12 = vector.load %arg10[%c0_7, %c0_8, %c0_9] : memref<8x8x128xf32, #tpu.memory_space<vmem>>, vector<8x8x128xf32>
    tpu.vector_store %arg10[%c0_7, %c0_8, %c0_9], %11 {strides = array<i32>} : memref<8x8x128xf32, #tpu.memory_space<vmem>>, vector<8x8x128xf32>,
    %c0_10 = arith.constant 0 : index
    %c0_11 = arith.constant 0 : index
    %13 = vector.load %arg9[%c0_10, %c0_11] : memref<8x128xf32, #tpu.memory_space<vmem>>, vector<8x128xf32>
    %c0_i32_12 = arith.constant 0 : i32
    %14 = arith.index_cast %c0_i32_12 : i32 to index
    %c0_13 = arith.constant 0 : index
    %c0_14 = arith.constant 0 : index
    %15 = vector.load %arg10[%14, %c0_13, %c0_14] : memref<8x8x128xf32, #tpu.memory_space<vmem>>, vector<1x8x128xf32>
    %16 = vector.shape_cast %15 : vector<1x8x128xf32> to vector<8x128xf32>
    %17 = arith.truncf %13 : vector<8x128xf32> to vector<8x128xbf16>
    %c0_15 = arith.constant 0 : index
    %c0_16 = arith.constant 0 : index
    %18 = vector.load %arg4[%c0_15, %c0_16] : memref<128x128xbf16, #tpu.memory_space<vmem>>, vector<128x128xbf16>
    %cst_17 = arith.constant dense<0.000000e+00> : vector<8x128xf32>
    %19 = tpu.matmul %17, %18, %cst_17 {dimension_numbers = #tpu.dot_dimension_numbers<[1], [0], [0], [1], [0, 0, 1, 1], [], []>} : vector<8x128xbf16>, vector<128x128xbf16>, vector<8x128xf32> -> vector<8x128xf32>
    %20 = arith.addf %16, %19 : vector<8x128xf32>
    %21 = math.tanh %20 : vector<8x128xf32>
    %22 = arith.index_cast %c0_i32_12 : i32 to index
    %c0_18 = arith.constant 0 : index
    %c0_19 = arith.constant 0 : index
    %23 = vector.load %arg10[%22, %c0_18, %c0_19] : memref<8x8x128xf32, #tpu.memory_space<vmem>>, vector<1x8x128xf32>
    %24 = vector.shape_cast %23 : vector<1x8x128xf32> to vector<8x128xf32>
    %25 = vector.shape_cast %21 : vector<8x128xf32> to vector<1x8x128xf32>
    tpu.vector_store %arg10[%22, %c0_18, %c0_19], %25 {strides = array<i32>} : memref<8x8x128xf32, #tpu.memory_space<vmem>>, vector<1x8x128xf32>,
    %c1_i32 = arith.constant 1 : i32
    %26 = arith.index_cast %c1_i32 : i32 to index
    %c0_20 = arith.constant 0 : index
    %c0_21 = arith.constant 0 : index
    %27 = vector.load %arg10[%26, %c0_20, %c0_21] : memref<8x8x128xf32, #tpu.memory_space<vmem>>, vector<1x8x128xf32>
    %28 = vector.shape_cast %27 : vector<1x8x128xf32> to vector<8x128xf32>
    %29 = arith.truncf %21 : vector<8x128xf32> to vector<8x128xbf16>
    %c0_22 = arith.constant 0 : index
    %c0_23 = arith.constant 0 : index
    %30 = vector.load %arg4[%c0_22, %c0_23] : memref<128x128xbf16, #tpu.memory_space<vmem>>, vector<128x128xbf16>
    %cst_24 = arith.constant dense<0.000000e+00> : vector<8x128xf32>
    %31 = tpu.matmul %29, %30, %cst_24 {dimension_numbers = #tpu.dot_dimension_numbers<[1], [0], [0], [1], [0, 0, 1, 1], [], []>} : vector<8x128xbf16>, vector<128x128xbf16>, vector<8x128xf32> -> vector<8x128xf32>
    %32 = arith.addf %28, %31 : vector<8x128xf32>
    %33 = math.tanh %32 : vector<8x128xf32>
    %34 = arith.index_cast %c1_i32 : i32 to index
    %c0_25 = arith.constant 0 : index
    %c0_26 = arith.constant 0 : index
    %35 = vector.load %arg10[%34, %c0_25, %c0_26] : memref<8x8x128xf32, #tpu.memory_space<vmem>>, vector<1x8x128xf32>
    %36 = vector.shape_cast %35 : vector<1x8x128xf32> to vector<8x128xf32>
    %37 = vector.shape_cast %33 : vector<8x128xf32> to vector<1x8x128xf32>
    tpu.vector_store %arg10[%34, %c0_25, %c0_26], %37 {strides = array<i32>} : memref<8x8x128xf32, #tpu.memory_space<vmem>>, vector<1x8x128xf32>,
    %c2_i32 = arith.constant 2 : i32
    %38 = arith.index_cast %c2_i32 : i32 to index
    %c0_27 = arith.constant 0 : index
    %c0_28 = arith.constant 0 : index
    %39 = vector.load %arg10[%38, %c0_27, %c0_28] : memref<8x8x128xf32, #tpu.memory_space<vmem>>, vector<1x8x128xf32>
    %40 = vector.shape_cast %39 : vector<1x8x128xf32> to vector<8x128xf32>
    %41 = arith.truncf %33 : vector<8x128xf32> to vector<8x128xbf16>
    %c0_29 = arith.constant 0 : index
    %c0_30 = arith.constant 0 : index
    %42 = vector.load %arg4[%c0_29, %c0_30] : memref<128x128xbf16, #tpu.memory_space<vmem>>, vector<128x128xbf16>
    %cst_31 = arith.constant dense<0.000000e+00> : vector<8x128xf32>
    %43 = tpu.matmul %41, %42, %cst_31 {dimension_numbers = #tpu.dot_dimension_numbers<[1], [0], [0], [1], [0, 0, 1, 1], [], []>} : vector<8x128xbf16>, vector<128x128xbf16>, vector<8x128xf32> -> vector<8x128xf32>
    %44 = arith.addf %40, %43 : vector<8x128xf32>
    %45 = math.tanh %44 : vector<8x128xf32>
    %46 = arith.index_cast %c2_i32 : i32 to index
    %c0_32 = arith.constant 0 : index
    %c0_33 = arith.constant 0 : index
    %47 = vector.load %arg10[%46, %c0_32, %c0_33] : memref<8x8x128xf32, #tpu.memory_space<vmem>>, vector<1x8x128xf32>
    %48 = vector.shape_cast %47 : vector<1x8x128xf32> to vector<8x128xf32>
    %49 = vector.shape_cast %45 : vector<8x128xf32> to vector<1x8x128xf32>
    tpu.vector_store %arg10[%46, %c0_32, %c0_33], %49 {strides = array<i32>} : memref<8x8x128xf32, #tpu.memory_space<vmem>>, vector<1x8x128xf32>,
    %c3_i32 = arith.constant 3 : i32
    %50 = arith.index_cast %c3_i32 : i32 to index
    %c0_34 = arith.constant 0 : index
    %c0_35 = arith.constant 0 : index
    %51 = vector.load %arg10[%50, %c0_34, %c0_35] : memref<8x8x128xf32, #tpu.memory_space<vmem>>, vector<1x8x128xf32>
    %52 = vector.shape_cast %51 : vector<1x8x128xf32> to vector<8x128xf32>
    %53 = arith.truncf %45 : vector<8x128xf32> to vector<8x128xbf16>
    %c0_36 = arith.constant 0 : index
    %c0_37 = arith.constant 0 : index
    %54 = vector.load %arg4[%c0_36, %c0_37] : memref<128x128xbf16, #tpu.memory_space<vmem>>, vector<128x128xbf16>
    %cst_38 = arith.constant dense<0.000000e+00> : vector<8x128xf32>
    %55 = tpu.matmul %53, %54, %cst_38 {dimension_numbers = #tpu.dot_dimension_numbers<[1], [0], [0], [1], [0, 0, 1, 1], [], []>} : vector<8x128xbf16>, vector<128x128xbf16>, vector<8x128xf32> -> vector<8x128xf32>
    %56 = arith.addf %52, %55 : vector<8x128xf32>
    %57 = math.tanh %56 : vector<8x128xf32>
    %58 = arith.index_cast %c3_i32 : i32 to index
    %c0_39 = arith.constant 0 : index
    %c0_40 = arith.constant 0 : index
    %59 = vector.load %arg10[%58, %c0_39, %c0_40] : memref<8x8x128xf32, #tpu.memory_space<vmem>>, vector<1x8x128xf32>
    %60 = vector.shape_cast %59 : vector<1x8x128xf32> to vector<8x128xf32>
    %61 = vector.shape_cast %57 : vector<8x128xf32> to vector<1x8x128xf32>
    tpu.vector_store %arg10[%58, %c0_39, %c0_40], %61 {strides = array<i32>} : memref<8x8x128xf32, #tpu.memory_space<vmem>>, vector<1x8x128xf32>,
    %c4_i32 = arith.constant 4 : i32
    %62 = arith.index_cast %c4_i32 : i32 to index
    %c0_41 = arith.constant 0 : index
    %c0_42 = arith.constant 0 : index
    %63 = vector.load %arg10[%62, %c0_41, %c0_42] : memref<8x8x128xf32, #tpu.memory_space<vmem>>, vector<1x8x128xf32>
    %64 = vector.shape_cast %63 : vector<1x8x128xf32> to vector<8x128xf32>
    %65 = arith.truncf %57 : vector<8x128xf32> to vector<8x128xbf16>
    %c0_43 = arith.constant 0 : index
    %c0_44 = arith.constant 0 : index
    %66 = vector.load %arg4[%c0_43, %c0_44] : memref<128x128xbf16, #tpu.memory_space<vmem>>, vector<128x128xbf16>
    %cst_45 = arith.constant dense<0.000000e+00> : vector<8x128xf32>
    %67 = tpu.matmul %65, %66, %cst_45 {dimension_numbers = #tpu.dot_dimension_numbers<[1], [0], [0], [1], [0, 0, 1, 1], [], []>} : vector<8x128xbf16>, vector<128x128xbf16>, vector<8x128xf32> -> vector<8x128xf32>
    %68 = arith.addf %64, %67 : vector<8x128xf32>
    %69 = math.tanh %68 : vector<8x128xf32>
    %70 = arith.index_cast %c4_i32 : i32 to index
    %c0_46 = arith.constant 0 : index
    %c0_47 = arith.constant 0 : index
    %71 = vector.load %arg10[%70, %c0_46, %c0_47] : memref<8x8x128xf32, #tpu.memory_space<vmem>>, vector<1x8x128xf32>
    %72 = vector.shape_cast %71 : vector<1x8x128xf32> to vector<8x128xf32>
    %73 = vector.shape_cast %69 : vector<8x128xf32> to vector<1x8x128xf32>
    tpu.vector_store %arg10[%70, %c0_46, %c0_47], %73 {strides = array<i32>} : memref<8x8x128xf32, #tpu.memory_space<vmem>>, vector<1x8x128xf32>,
    %c5_i32 = arith.constant 5 : i32
    %74 = arith.index_cast %c5_i32 : i32 to index
    %c0_48 = arith.constant 0 : index
    %c0_49 = arith.constant 0 : index
    %75 = vector.load %arg10[%74, %c0_48, %c0_49] : memref<8x8x128xf32, #tpu.memory_space<vmem>>, vector<1x8x128xf32>
    %76 = vector.shape_cast %75 : vector<1x8x128xf32> to vector<8x128xf32>
    %77 = arith.truncf %69 : vector<8x128xf32> to vector<8x128xbf16>
    %c0_50 = arith.constant 0 : index
    %c0_51 = arith.constant 0 : index
    %78 = vector.load %arg4[%c0_50, %c0_51] : memref<128x128xbf16, #tpu.memory_space<vmem>>, vector<128x128xbf16>
    %cst_52 = arith.constant dense<0.000000e+00> : vector<8x128xf32>
    %79 = tpu.matmul %77, %78, %cst_52 {dimension_numbers = #tpu.dot_dimension_numbers<[1], [0], [0], [1], [0, 0, 1, 1], [], []>} : vector<8x128xbf16>, vector<128x128xbf16>, vector<8x128xf32> -> vector<8x128xf32>
    %80 = arith.addf %76, %79 : vector<8x128xf32>
    %81 = math.tanh %80 : vector<8x128xf32>
    %82 = arith.index_cast %c5_i32 : i32 to index
    %c0_53 = arith.constant 0 : index
    %c0_54 = arith.constant 0 : index
    %83 = vector.load %arg10[%82, %c0_53, %c0_54] : memref<8x8x128xf32, #tpu.memory_space<vmem>>, vector<1x8x128xf32>
    %84 = vector.shape_cast %83 : vector<1x8x128xf32> to vector<8x128xf32>
    %85 = vector.shape_cast %81 : vector<8x128xf32> to vector<1x8x128xf32>
    tpu.vector_store %arg10[%82, %c0_53, %c0_54], %85 {strides = array<i32>} : memref<8x8x128xf32, #tpu.memory_space<vmem>>, vector<1x8x128xf32>,
    %c6_i32 = arith.constant 6 : i32
    %86 = arith.index_cast %c6_i32 : i32 to index
    %c0_55 = arith.constant 0 : index
    %c0_56 = arith.constant 0 : index
    %87 = vector.load %arg10[%86, %c0_55, %c0_56] : memref<8x8x128xf32, #tpu.memory_space<vmem>>, vector<1x8x128xf32>
    %88 = vector.shape_cast %87 : vector<1x8x128xf32> to vector<8x128xf32>
    %89 = arith.truncf %81 : vector<8x128xf32> to vector<8x128xbf16>
    %c0_57 = arith.constant 0 : index
    %c0_58 = arith.constant 0 : index
    %90 = vector.load %arg4[%c0_57, %c0_58] : memref<128x128xbf16, #tpu.memory_space<vmem>>, vector<128x128xbf16>
    %cst_59 = arith.constant dense<0.000000e+00> : vector<8x128xf32>
    %91 = tpu.matmul %89, %90, %cst_59 {dimension_numbers = #tpu.dot_dimension_numbers<[1], [0], [0], [1], [0, 0, 1, 1], [], []>} : vector<8x128xbf16>, vector<128x128xbf16>, vector<8x128xf32> -> vector<8x128xf32>
    %92 = arith.addf %88, %91 : vector<8x128xf32>
    %93 = math.tanh %92 : vector<8x128xf32>
    %94 = arith.index_cast %c6_i32 : i32 to index
    %c0_60 = arith.constant 0 : index
    %c0_61 = arith.constant 0 : index
    %95 = vector.load %arg10[%94, %c0_60, %c0_61] : memref<8x8x128xf32, #tpu.memory_space<vmem>>, vector<1x8x128xf32>
    %96 = vector.shape_cast %95 : vector<1x8x128xf32> to vector<8x128xf32>
    %97 = vector.shape_cast %93 : vector<8x128xf32> to vector<1x8x128xf32>
    tpu.vector_store %arg10[%94, %c0_60, %c0_61], %97 {strides = array<i32>} : memref<8x8x128xf32, #tpu.memory_space<vmem>>, vector<1x8x128xf32>,
    %c7_i32 = arith.constant 7 : i32
    %98 = arith.index_cast %c7_i32 : i32 to index
    %c0_62 = arith.constant 0 : index
    %c0_63 = arith.constant 0 : index
    %99 = vector.load %arg10[%98, %c0_62, %c0_63] : memref<8x8x128xf32, #tpu.memory_space<vmem>>, vector<1x8x128xf32>
    %100 = vector.shape_cast %99 : vector<1x8x128xf32> to vector<8x128xf32>
    %101 = arith.truncf %93 : vector<8x128xf32> to vector<8x128xbf16>
    %c0_64 = arith.constant 0 : index
    %c0_65 = arith.constant 0 : index
    %102 = vector.load %arg4[%c0_64, %c0_65] : memref<128x128xbf16, #tpu.memory_space<vmem>>, vector<128x128xbf16>
    %cst_66 = arith.constant dense<0.000000e+00> : vector<8x128xf32>
    %103 = tpu.matmul %101, %102, %cst_66 {dimension_numbers = #tpu.dot_dimension_numbers<[1], [0], [0], [1], [0, 0, 1, 1], [], []>} : vector<8x128xbf16>, vector<128x128xbf16>, vector<8x128xf32> -> vector<8x128xf32>
    %104 = arith.addf %100, %103 : vector<8x128xf32>
    %105 = math.tanh %104 : vector<8x128xf32>
    %106 = arith.index_cast %c7_i32 : i32 to index
    %c0_67 = arith.constant 0 : index
    %c0_68 = arith.constant 0 : index
    %107 = vector.load %arg10[%106, %c0_67, %c0_68] : memref<8x8x128xf32, #tpu.memory_space<vmem>>, vector<1x8x128xf32>
    %108 = vector.shape_cast %107 : vector<1x8x128xf32> to vector<8x128xf32>
    %109 = vector.shape_cast %105 : vector<8x128xf32> to vector<1x8x128xf32>
    tpu.vector_store %arg10[%106, %c0_67, %c0_68], %109 {strides = array<i32>} : memref<8x8x128xf32, #tpu.memory_space<vmem>>, vector<1x8x128xf32>,
    %c8_i32 = arith.constant 8 : i32
    %c0_69 = arith.constant 0 : index
    %c0_70 = arith.constant 0 : index
    %110 = vector.load %arg9[%c0_69, %c0_70] : memref<8x128xf32, #tpu.memory_space<vmem>>, vector<8x128xf32>
    tpu.vector_store %arg9[%c0_69, %c0_70], %105 {strides = array<i32>} : memref<8x128xf32, #tpu.memory_space<vmem>>, vector<8x128xf32>,
    %c0_71 = arith.constant 0 : index
    %c0_72 = arith.constant 0 : index
    %c0_73 = arith.constant 0 : index
    %111 = vector.load %arg10[%c0_71, %c0_72, %c0_73] : memref<8x8x128xf32, #tpu.memory_space<vmem>>, vector<8x8x128xf32>
    %112 = vector.shape_cast %111 : vector<8x8x128xf32> to vector<64x128xf32>
    %113 = arith.truncf %112 : vector<64x128xf32> to vector<64x128xbf16>
    %c0_74 = arith.constant 0 : index
    %c0_75 = arith.constant 0 : index
    %114 = vector.load %arg5[%c0_74, %c0_75] : memref<128x128xbf16, #tpu.memory_space<vmem>>, vector<128x128xbf16>
    %cst_76 = arith.constant dense<0.000000e+00> : vector<64x128xf32>
    %115 = tpu.matmul %113, %114, %cst_76 {dimension_numbers = #tpu.dot_dimension_numbers<[1], [0], [0], [1], [0, 0, 1, 1], [], []>} : vector<64x128xbf16>, vector<128x128xbf16>, vector<64x128xf32> -> vector<64x128xf32>
    %c0_77 = arith.constant 0 : index
    %c0_78 = arith.constant 0 : index
    %116 = vector.load %arg7[%c0_77, %c0_78] : memref<1x128xf32, #tpu.memory_space<vmem>>, vector<1x128xf32>
    %117 = vector.broadcast %116 : vector<1x128xf32> to vector<64x128xf32>
    %118 = arith.addf %115, %117 : vector<64x128xf32>
    %119 = vector.shape_cast %118 : vector<64x128xf32> to vector<8x8x128xf32>
    %c0_79 = arith.constant 0 : index
    %c0_80 = arith.constant 0 : index
    %c0_81 = arith.constant 0 : index
    %120 = vector.load %arg8[%c0_79, %c0_80, %c0_81] : memref<8x8x128xf32, #tpu.memory_space<vmem>>, vector<8x8x128xf32>
    tpu.vector_store %arg8[%c0_79, %c0_80, %c0_81], %119 {strides = array<i32>} : memref<8x8x128xf32, #tpu.memory_space<vmem>>, vector<8x8x128xf32>,
    return
  }
  func.func @transform_0(%arg0: i32, %arg1: i32) -> (i32, i32, i32) {
    %c0_i32 = arith.constant 0 : i32
    %c0_i32_0 = arith.constant 0 : i32
    return %arg1, %arg0, %c0_i32 : i32, i32, i32
  }
  func.func @transform_1(%arg0: i32, %arg1: i32) -> (i32, i32) {
    %c0_i32 = arith.constant 0 : i32
    %c0_i32_0 = arith.constant 0 : i32
    %c0_i32_1 = arith.constant 0 : i32
    return %c0_i32, %c0_i32_0 : i32, i32
  }
  func.func @transform_2(%arg0: i32, %arg1: i32) -> (i32, i32) {
    %c0_i32 = arith.constant 0 : i32
    %c0_i32_0 = arith.constant 0 : i32
    %c0_i32_1 = arith.constant 0 : i32
    return %c0_i32, %c0_i32_0 : i32, i32
  }
  func.func @transform_3(%arg0: i32, %arg1: i32) -> (i32, i32) {
    %c0_i32 = arith.constant 0 : i32
    %c0_i32_0 = arith.constant 0 : i32
    %c0_i32_1 = arith.constant 0 : i32
    return %c0_i32, %c0_i32_0 : i32, i32
  }
  func.func @transform_4(%arg0: i32, %arg1: i32) -> (i32, i32) {
    %c0_i32 = arith.constant 0 : i32
    %c0_i32_0 = arith.constant 0 : i32
    %c0_i32_1 = arith.constant 0 : i32
    return %c0_i32, %c0_i32_0 : i32, i32
  }
  func.func @transform_5(%arg0: i32, %arg1: i32) -> (i32, i32) {
    %c0_i32 = arith.constant 0 : i32
    %c0_i32_0 = arith.constant 0 : i32
    %c0_i32_1 = arith.constant 0 : i32
    return %c0_i32, %c0_i32_0 : i32, i32
  }
  func.func @transform_6(%arg0: i32, %arg1: i32) -> (i32, i32, i32) {
    %c0_i32 = arith.constant 0 : i32
    %c0_i32_0 = arith.constant 0 : i32
    return %arg1, %arg0, %c0_i32 : i32, i32, i32
  }
}

</mosaic_0001>

<bundles_post_ra>
// kernel: tpu_custom_call.1
= control target key start
LH: loop header
LB: loop body
LE: loop exit
PB: predicated region body
PF: predicated region fallthrough
CT: control target
= control target key end

     0   :  { %11 = vsyncpa [#allocation5], 0  ;;  %s2217_s0 = inlined_call_operand.hbm [shape: bf16[8,8,128], index: 0, kind: input, shape index: {}]   ;;  %s2218_s1 = inlined_call_operand.hbm [shape: bf16[128,128], index: 1, kind: input, shape index: {}]   ;;  %s2219_s2 = inlined_call_operand.hbm [shape: bf16[128,128], index: 2, kind: input, shape index: {}]   ;;  %s2220_s3 = inlined_call_operand.hbm [shape: bf16[128,128], index: 3, kind: input, shape index: {}]   ;;  %s2221_s4 = inlined_call_operand.vmem [shape: f32[1,128], index: 4, kind: input, shape index: {}]   ;;  %s2222_s5 = inlined_call_operand.vmem [shape: f32[1,128], index: 5, kind: input, shape index: {}]   ;;  %s2223_s6 = inlined_call_operand.hbm [shape: f32[8,8,128], index: 6, kind: output, shape index: {}]  }
   0x1   :  { %12 = vsyncpa [#allocation8], 0 }
   0x2   :  { %13 = vsyncpa [#allocation11], 0 }
   0x3   :  { %14 = vsyncpa [#allocation6], 0  ;;  %s1945_s21 = smov [#allocation7]   ;;  %s1946_s23 = smov [#allocation4]  }
   0x4   :  { %s32_s22 = sshll.u32 %s1945_s21, 4  ;;  %s20_s24 = sshll.u32 %s1946_s23, 4  ;;  %s33_s22 = int_to_ptr.vmem [resolvable:$true] %s32_s22  ;;  %s1992_s24 = int_to_ptr.vmem [resolvable:$true] %s20_s24 }
   0x5   :  { %s1827_s27 = scalar_lea.hbm %s2218_s1, 1024 }
   0x6   :  { %p1828_p0 = scmp.ne.s32.totalorder %s2218_s1, %s1827_s27  ;;  %p1831_p1 = scmp.lt.u32.totalorder %s1827_s27, %s2218_s1 }
   0x8   :  { %p1833_p2 = pnand %p1831_p1, %p1828_p0 }
   0xa   :  { %1836 = shalt.err (!%p1833_p2)
}
   0xb   :  { %s1837_s8 = scalar_lea.vmem %s33_s22, 1024  ;;  %p1842_p4 = scmp.lt.s32.totalorder %s33_s22, %s33_s22 }
   0xc   :  { %p1838_p3 = scmp.ne.s32.totalorder %s33_s22, %s1837_s8  ;;  %p1843_p5 = scmp.lt.s32.totalorder %s1837_s8, %s1837_s8 }
   0xe   :  { %p1844_p6 = por %p1843_p5, %p1842_p4 }
  0x10   :  { %p1845_p7 = pnand %p1844_p6, %p1838_p3 }
  0x12   :  { %1848 = shalt.err (!%p1845_p7)
}
  0x13   :  { %s1947_s9 = smov 64   ;;  %s1948_s10 = smov 4  }
  0x14   :  { %38 = dma.hbm_to_vmem [thread:$0]  %s2218_s1, 1024, %s33_s22, [#allocation8], %s1947_s9, %s1947_s9, %s1948_s10  }
  0x15   :  { %s1849_s15 = scalar_lea.hbm %s2217_s0, 512 }
  0x16   :  { %p1850_p8 = scmp.ne.s32.totalorder %s2217_s0, %s1849_s15  ;;  %p1853_p9 = scmp.lt.u32.totalorder %s1849_s15, %s2217_s0 }
  0x18   :  { %p1855_p10 = pnand %p1853_p9, %p1850_p8 }
  0x1a   :  { %1858 = shalt.err (!%p1855_p10)
}
  0x1b   :  { %s1859_s20 = scalar_lea.vmem %s1992_s24, 512  ;;  %p1864_p12 = scmp.lt.s32.totalorder %s1992_s24, %s1992_s24 }
  0x1c   :  { %p1860_p11 = scmp.ne.s32.totalorder %s1992_s24, %s1859_s20  ;;  %p1865_p13 = scmp.lt.s32.totalorder %s1859_s20, %s1859_s20 }
  0x1e   :  { %p1866_p0 = por %p1865_p13, %p1864_p12 }
  0x20   :  { %p1867_p1 = pnand %p1866_p0, %p1860_p11 }
  0x22   :  { %1870 = shalt.err (!%p1867_p1)
}
  0x23   :  { %26 = dma.hbm_to_vmem [thread:$0]  %s2217_s0, 512, %s1992_s24, [#allocation5], %s1947_s9, %s1947_s9, %s1948_s10  }
  0x24   :  { %s1949_s22 = smov [#allocation9]   ;;  %s1950_s25 = smov [#allocation10]  }
  0x25   :  { %s44_s23 = sshll.u32 %s1949_s22, 4  ;;  %s56_s26 = sshll.u32 %s1950_s25, 4  ;;  %s45_s23 = int_to_ptr.vmem [resolvable:$true] %s44_s23  ;;  %s2029_s26 = int_to_ptr.vmem [resolvable:$true] %s56_s26 }
  0x26   :  { %s1871_s29 = scalar_lea.hbm %s2219_s2, 1024 }
  0x27   :  { %p1872_p2 = scmp.ne.s32.totalorder %s2219_s2, %s1871_s29  ;;  %p1875_p3 = scmp.lt.u32.totalorder %s1871_s29, %s2219_s2 }
  0x29   :  { %p1877_p4 = pnand %p1875_p3, %p1872_p2 }
  0x2b   :  { %1880 = shalt.err (!%p1877_p4)
}
  0x2c   :  { %s1881_s0 = scalar_lea.vmem %s45_s23, 1024  ;;  %p1886_p6 = scmp.lt.s32.totalorder %s45_s23, %s45_s23 }
  0x2d   :  { %p1882_p5 = scmp.ne.s32.totalorder %s45_s23, %s1881_s0  ;;  %p1887_p7 = scmp.lt.s32.totalorder %s1881_s0, %s1881_s0 }
  0x2f   :  { %p1888_p8 = por %p1887_p7, %p1886_p6 }
  0x31   :  { %p1889_p9 = pnand %p1888_p8, %p1882_p5 }
  0x33   :  { %1892 = shalt.err (!%p1889_p9)
}
  0x34   :  { %50 = dma.hbm_to_vmem [thread:$0]  %s2219_s2, 1024, %s45_s23, [#allocation8], %s1947_s9, %s1947_s9, %s1948_s10  }
  0x35   :  { %s1893_s15 = scalar_lea.hbm %s2220_s3, 1024 }
  0x36   :  { %p1894_p10 = scmp.ne.s32.totalorder %s2220_s3, %s1893_s15  ;;  %p1897_p11 = scmp.lt.u32.totalorder %s1893_s15, %s2220_s3 }
  0x38   :  { %p1899_p12 = pnand %p1897_p11, %p1894_p10 }
  0x3a   :  { %1902 = shalt.err (!%p1899_p12)
}
  0x3b   :  { %s1903_s20 = scalar_lea.vmem %s2029_s26, 1024  ;;  %p1908_p0 = scmp.lt.s32.totalorder %s2029_s26, %s2029_s26 }
  0x3c   :  { %p1904_p13 = scmp.ne.s32.totalorder %s2029_s26, %s1903_s20  ;;  %p1909_p1 = scmp.lt.s32.totalorder %s1903_s20, %s1903_s20 }
  0x3e   :  { %p1910_p2 = por %p1909_p1, %p1908_p0 }
  0x40   :  { %p1911_p3 = pnand %p1910_p2, %p1904_p13 }
  0x42   :  { %1914 = shalt.err (!%p1911_p3)
}
  0x43   :  { %62 = dma.hbm_to_vmem [thread:$0]  %s2220_s3, 1024, %s2029_s26, [#allocation11], %s1947_s9, %s1947_s9, %s1948_s10  }
  0x44   :  { %1937 = dma.done.wait [#allocation5], 512  }
  0x45   :  { %1938 = vsyncadd [#allocation5], 4294966784 }
  0x46   :  { %1939 = dma.done.wait [#allocation8], 2048  }
  0x47   :  { %1940 = vsyncadd [#allocation8], 4294965248 }
  0x48   :  { %1941 = dma.done.wait [#allocation11], 1024  }
  0x49   :  { %1942 = vsyncadd [#allocation11], 4294966272  ;;  %v1951_v0 = vmov 0.0   ;;  %vm1952_vm0 = vmmov 0   ;;  %v1727_v1 = vld [vmem:[#allocation7] sm:$0xff]   ;;  %v1729_v3 = vld [vmem:[#allocation7 + $0x8] sm:$0xff]  }
  0x4a   :  { %1531 = vmatprep.subr.bf16.mxu1 %v1951_v0  ;;  %1547 = vmatprep.mubr.msk.bf16.mxu1 %vm1952_vm0, %v1951_v0  ;;  %v1728_v2 = vld [vmem:[#allocation9] sm:$0xff]   ;;  %v1730_v4 = vld [vmem:[#allocation9 + $0x8] sm:$0xff]   ;;  %v1731_v5 = vld [vmem:[#allocation7 + $0x10] sm:$0xff]   ;;  %v1953_v21 = vmov 0.0|0.0  }
  0x4b   :  { %1507 = vmatprep.subr.bf16.mxu0 %v1727_v1  ;;  %1532 = vmatpush3.bf16.msra.mxu1 %v1728_v2  ;;  %v1732_v6 = vld [vmem:[#allocation9 + $0x10] sm:$0xff]   ;;  %v1733_v7 = vld [vmem:[#allocation7 + $0x18] sm:$0xff]   ;;  %v1735_v9 = vld [vmem:[#allocation7 + $0x20] sm:$0xff]  }
  0x4c   :  { %1508 = vmatpush3.bf16.msra.mxu0 %v1727_v1  ;;  %1533 = vmatprep.subr.bf16.mxu1 %v1951_v0  ;;  %v1734_v8 = vld [vmem:[#allocation9 + $0x18] sm:$0xff]   ;;  %v1736_v10 = vld [vmem:[#allocation9 + $0x20] sm:$0xff]   ;;  %v1737_v11 = vld [vmem:[#allocation7 + $0x28] sm:$0xff]  }
  0x4d   :  { %1509 = vmatprep.subr.bf16.mxu0 %v1729_v3  ;;  %v1743_v12 = vld [vmem:[#allocation4] sm:$0xff]   ;;  %v1738_v13 = vld [vmem:[#allocation9 + $0x28] sm:$0xff]   ;;  %v1739_v14 = vld [vmem:[#allocation7 + $0x30] sm:$0xff]  }
  0x4e   :  { %1523 = vmatprep.mubr.bf16.mxu0 %v1743_v12  ;;  %v1740_v15 = vld [vmem:[#allocation9 + $0x30] sm:$0xff]   ;;  %v1741_v16 = vld [vmem:[#allocation7 + $0x38] sm:$0xff]   ;;  %v1744_v18 = vld [vmem:[#allocation4 + $0x8] sm:$0xff]  }
  0x4f   :  { %1534 = vmatpush3.bf16.msra.mxu1 %v1730_v4  ;;  %v1742_v17 = vld [vmem:[#allocation9 + $0x38] sm:$0xff]   ;;  %v1745_v19 = vld [vmem:[#allocation9] sm:$0xff]   ;;  %v1746_v20 = vld [vmem:[#allocation9 + $0x8] sm:$0xff]  }
  0x50   :  { %1510 = vmatpush3.bf16.msra.mxu0 %v1729_v3  ;;  %1535 = vmatprep.subr.bf16.mxu1 %v1951_v0  ;;  %v1747_v22 = vld [vmem:[#allocation9 + $0x10] sm:$0xff]   ;;  %v1748_v23 = vld [vmem:[#allocation9 + $0x18] sm:$0xff]   ;;  %v1749_v24 = vld [vmem:[#allocation9 + $0x20] sm:$0xff]  }
  0x51   :  { %1511 = vmatprep.subr.bf16.mxu0 %v1731_v5  ;;  %v1750_v25 = vld [vmem:[#allocation4 + $0x10] sm:$0xff]   ;;  %v1751_v26 = vld [vmem:[#allocation4 + $0x18] sm:$0xff]   ;;  %v1752_v27 = vld [vmem:[#allocation9 + $0x28] sm:$0xff]  }
  0x52   :  { %v1753_v28 = vld [vmem:[#allocation9 + $0x30] sm:$0xff]   ;;  %v1754_v29 = vld [vmem:[#allocation9 + $0x38] sm:$0xff]   ;;  %v1755_v30 = vld [vmem:[#allocation9] sm:$0xff]  }
  0x53   :  { %1536 = vmatpush3.bf16.msra.mxu1 %v1732_v6  ;;  %v1756_v31 = vld [vmem:[#allocation9 + $0x8] sm:$0xff]   ;;  %v1757_v32 = vld [vmem:[#allocation9 + $0x10] sm:$0xff]   ;;  %v1758_v33 = vld [vmem:[#allocation9 + $0x18] sm:$0xff]  }
  0x54   :  { %1512 = vmatpush3.bf16.msra.mxu0 %v1731_v5  ;;  %1537 = vmatprep.subr.bf16.mxu1 %v1951_v0  ;;  %v2097_v34 = vld [vmem:[%s2221_s4] ss:$0 sm:$0xff]  ;;  %v1760_v52 = vld [vmem:[#allocation9 + $0x28] sm:$0xff]   ;;  %v1761_v53 = vld [vmem:[#allocation9 + $0x30] sm:$0xff]  }
  0x55   :  { %1513 = vmatprep.subr.bf16.mxu0 %v1733_v7  ;;  %v1759_v51 = vld [vmem:[#allocation9 + $0x20] sm:$0xff]   ;;  %v1762_v54 = vld [vmem:[#allocation9 + $0x38] sm:$0xff]   ;;  %v1764_v56 = vld [vmem:[#allocation9 + $0x8] sm:$0xff]  }
  0x56   :  { %v1763_v55 = vld [vmem:[#allocation9] sm:$0xff]   ;;  %v1765_v57 = vld [vmem:[#allocation9 + $0x10] sm:$0xff]   ;;  %v1766_v58 = vld [vmem:[#allocation9 + $0x18] sm:$0xff]  }
  0x57   :  { %1538 = vmatpush3.bf16.msra.mxu1 %v1734_v8  ;;  %v1767_v4 = vld [vmem:[#allocation9 + $0x20] sm:$0xff]   ;;  %v1768_v5 = vld [vmem:[#allocation9 + $0x28] sm:$0xff]   ;;  %v1769_v6 = vld [vmem:[#allocation9 + $0x30] sm:$0xff]  }
  0x58   :  { %1514 = vmatpush3.bf16.msra.mxu0 %v1733_v7  ;;  %1539 = vmatprep.subr.bf16.mxu1 %v1951_v0  ;;  %v1770_v7 = vld [vmem:[#allocation9 + $0x38] sm:$0xff]   ;;  %v1771_v8 = vld [vmem:[#allocation9] sm:$0xff]  }
  0x59   :  { %1515 = vmatprep.subr.bf16.mxu0 %v1735_v9 }
  0x5b   :  { %1540 = vmatpush3.bf16.msra.mxu1 %v1736_v10  ;;  %v1773_v10 = vld [vmem:[#allocation9 + $0x10] sm:$0xff]  }
  0x5c   :  { %1516 = vmatpush3.bf16.msra.mxu0 %v1735_v9  ;;  %1541 = vmatprep.subr.bf16.mxu1 %v1951_v0  ;;  %v1772_v9 = vld [vmem:[#allocation9 + $0x8] sm:$0xff]  }
  0x5d   :  { %1517 = vmatprep.subr.bf16.mxu0 %v1737_v11 }
  0x5f   :  { %1542 = vmatpush3.bf16.msra.mxu1 %v1738_v13 }
  0x60   :  { %1518 = vmatpush3.bf16.msra.mxu0 %v1737_v11  ;;  %1543 = vmatprep.subr.bf16.mxu1 %v1951_v0  ;;  %v1774_v11 = vld [vmem:[#allocation9 + $0x18] sm:$0xff]  }
  0x61   :  { %1519 = vmatprep.subr.bf16.mxu0 %v1739_v14 }
  0x63   :  { %1544 = vmatpush3.bf16.msra.mxu1 %v1740_v15 }
  0x64   :  { %1520 = vmatpush3.bf16.msra.mxu0 %v1739_v14  ;;  %1545 = vmatprep.subr.bf16.mxu1 %v1951_v0 }
  0x65   :  { %1521 = vmatprep.subr.bf16.mxu0 %v1741_v16 }
  0x67   :  { %1546 = vmatpush3.bf16.msra.mxu1 %v1742_v17 }
  0x68   :  { %1522 = vmatpush3.bf16.msra.mxu0 %v1741_v16  ;;  %1571 = vmatprep.subr.bf16.mxu1 %v1951_v0 }
  0x69   :  { %1551 = vmatprep.subr.bf16.mxu0 %v1951_v0 }
  0x6a   :  { %1548 = vmatmul.mubr.bf16.vlgmr.msra.gmra.mrb[0].mxu1 %v1953_v21  ;;  %v1776_v21 = vld [vmem:[#allocation9 + $0x28] sm:$0xff]  }
  0x6b   :  { %1524 = vmatmul.mubr.bf16.vlgmr.msra.gmra.mrb[0].mxu0 %v1744_v18  ;;  %1587 = vmatprep.mubr.msk.bf16.mxu1 %vm1952_vm0, %v1951_v0 }
  0x6c   :  { %1552 = vmatpush3.bf16.msra.mxu0 %v1745_v19  ;;  %1527 = vmatprep.mubr.bf16.mxu0 %v1750_v25  ;;  %v1780_v25 = vld [vmem:[#allocation9 + $0x8] sm:$0xff]  }
  0x6d   :  { %1553 = vmatprep.subr.bf16.mxu0 %v1951_v0  ;;  %1572 = vmatpush3.bf16.msra.mxu1 %v1755_v30 }
  0x6e   :  { %1573 = vmatprep.subr.bf16.mxu1 %v1951_v0 }
  0x70   :  { %1554 = vmatpush3.bf16.msra.mxu0 %v1746_v20  ;;  %v1775_v20 = vld [vmem:[#allocation9 + $0x20] sm:$0xff]  }
  0x71   :  { %1555 = vmatprep.subr.bf16.mxu0 %v1951_v0  ;;  %1574 = vmatpush3.bf16.msra.mxu1 %v1756_v31 }
  0x72   :  { %1575 = vmatprep.subr.bf16.mxu1 %v1951_v0 }
  0x73   :  { %1528 = vmatmul.mubr.bf16.gmra.mrb[4].mxu0 %v1751_v26  ;;  %v1781_v26 = vld [vmem:[#allocation9 + $0x10] sm:$0xff]  }
  0x74   :  { %1556 = vmatpush3.bf16.msra.mxu0 %v1747_v22  ;;  %1567 = vmatprep.mubr.msk.bf16.mxu0 %vm1952_vm0, %v1951_v0  ;;  %v1777_v22 = vld [vmem:[#allocation9 + $0x30] sm:$0xff]  }
  0x75   :  { %1557 = vmatprep.subr.bf16.mxu0 %v1951_v0  ;;  %1576 = vmatpush3.bf16.msra.mxu1 %v1757_v32 }
  0x76   :  { %1577 = vmatprep.subr.bf16.mxu1 %v1951_v0 }
  0x78   :  { %1558 = vmatpush3.bf16.msra.mxu0 %v1748_v23  ;;  %v1778_v23 = vld [vmem:[#allocation9 + $0x38] sm:$0xff]  }
  0x79   :  { %1559 = vmatprep.subr.bf16.mxu0 %v1951_v0  ;;  %1578 = vmatpush3.bf16.msra.mxu1 %v1758_v33 }
  0x7a   :  { %1579 = vmatprep.subr.bf16.mxu1 %v1951_v0 }
  0x7c   :  { %1560 = vmatpush3.bf16.msra.mxu0 %v1749_v24  ;;  %v1779_v24 = vld [vmem:[#allocation9] sm:$0xff]  }
  0x7d   :  { %1561 = vmatprep.subr.bf16.mxu0 %v1951_v0  ;;  %1580 = vmatpush3.bf16.msra.mxu1 %v1759_v51 }
  0x7e   :  { %1581 = vmatprep.subr.bf16.mxu1 %v1951_v0 }
  0x80   :  { %1562 = vmatpush3.bf16.msra.mxu0 %v1752_v27  ;;  %v1782_v27 = vld [vmem:[#allocation9 + $0x18] sm:$0xff]  }
  0x81   :  { %1563 = vmatprep.subr.bf16.mxu0 %v1951_v0  ;;  %1582 = vmatpush3.bf16.msra.mxu1 %v1760_v52 }
  0x82   :  { %1583 = vmatprep.subr.bf16.mxu1 %v1951_v0 }
  0x84   :  { %1564 = vmatpush3.bf16.msra.mxu0 %v1753_v28 }
  0x85   :  { %1565 = vmatprep.subr.bf16.mxu0 %v1951_v0  ;;  %1584 = vmatpush3.bf16.msra.mxu1 %v1761_v53 }
  0x86   :  { %1585 = vmatprep.subr.bf16.mxu1 %v1951_v0 }
  0x88   :  { %1566 = vmatpush3.bf16.msra.mxu0 %v1754_v29 }
  0x89   :  { %1591 = vmatprep.subr.bf16.mxu0 %v1951_v0  ;;  %1586 = vmatpush3.bf16.msra.mxu1 %v1762_v54 }
  0x8a   :  { %1611 = vmatprep.subr.bf16.mxu1 %v1951_v0 }
 0x13d   :  { %v370_v36 = vpop.f32.mrb[0].mxu1 }
 0x13e   :  { %v2099_v35 = vpop.f32.mrb[0].mxu0  ;;  %v1549_v38 = vpop.f32.mrb[1].mxu1 }
 0x13f   :  { %v215_v37 = vpop.f32.mrb[1].mxu0  ;;  %v373_v41 = vpop.f32.mrb[2].mxu1  ;;  %v255_v12 = vadd.f32 %v2099_v35, %v2097_v34  ;;  %v1784_v38 = vld [vmem:[#allocation9 + $0x28] sm:$0xff]  }
 0x140   :  { %v253_v39 = vadd.f32 %v2097_v34, %v215_v37  ;;  %v2102_v40 = vpop.f32.mrb[2].mxu0  ;;  %v1550_v43 = vpop.f32.mrb[3].mxu1  ;;  %v1783_v37 = vld [vmem:[#allocation9 + $0x20] sm:$0xff]  }
 0x141   :  { %v218_v42 = vpop.f32.mrb[3].mxu0  ;;  %v256_v28 = vadd.f32 %v2102_v40, %v2097_v34  ;;  %v1786_v40 = vld [vmem:[#allocation9 + $0x38] sm:$0xff]   ;;  %v1787_v41 = vld [vmem:[#allocation9] sm:$0xff]   ;;  %v1789_v43 = vld [vmem:[#allocation9 + $0x10] sm:$0xff]  }
 0x142   :  { %v376_v44 = vadd.f32 %v370_v36, %v253_v39  ;;  %v254_v59 = vadd.f32 %v2097_v34, %v218_v42  ;;  %v1785_v39 = vld [vmem:[#allocation9 + $0x30] sm:$0xff]   ;;  %v1788_v42 = vld [vmem:[#allocation9 + $0x8] sm:$0xff]  }
 0x144   :  { %1811 = vtanh.f32 %v376_v44  ;;  %v1790_v44 = vld [vmem:[#allocation9 + $0x18] sm:$0xff]  }
 0x146   :  { %v2110_v47 = vpop.f32.mrb[4].mxu0 }
 0x147   :  { %v2112_v48 = vpop.f32.mrb[5].mxu0 }
 0x148   :  { %v2114_v49 = vpop.f32.mrb[6].mxu0 }
 0x149   :  { %v2116_v50 = vpop.f32.mrb[7].mxu0 }
 0x14e   :  { %v2104_v45 = vpop.eup %1811 }
 0x14f   :  { %v381_v46 = vpack.c.bf16 %v2104_v45, %v2104_v45 }
 0x151   :  { %1568 = vmatmul.mubr.bf16.vlgmr.msra.gmra.mrb[8].mxu0 %v381_v46  ;;  %v257_v46 = vadd.f32 %v2097_v34, %v2112_v48  ;;  %v1792_v48 = vld [vmem:[#allocation9 + $0x28] sm:$0xff]  }
 0x152   :  { %1607 = vmatprep.mubr.msk.bf16.mxu0 %vm1952_vm0, %v1951_v0  ;;  %1592 = vmatpush3.bf16.msra.mxu0 %v1763_v55 }
 0x153   :  { %1593 = vmatprep.subr.bf16.mxu0 %v1951_v0 }
 0x156   :  { %1594 = vmatpush3.bf16.msra.mxu0 %v1764_v56 }
 0x157   :  { %1595 = vmatprep.subr.bf16.mxu0 %v1951_v0 }
 0x15a   :  { %1596 = vmatpush3.bf16.msra.mxu0 %v1765_v57 }
 0x15b   :  { %1597 = vmatprep.subr.bf16.mxu0 %v1951_v0 }
 0x15e   :  { %1598 = vmatpush3.bf16.msra.mxu0 %v1766_v58  ;;  %v1791_v58 = vld [vmem:[#allocation9 + $0x20] sm:$0xff]  }
 0x15f   :  { %1599 = vmatprep.subr.bf16.mxu0 %v1951_v0 }
 0x162   :  { %1600 = vmatpush3.bf16.msra.mxu0 %v1767_v4  ;;  %v258_v4 = vadd.f32 %v2097_v34, %v2116_v50  ;;  %v1798_v50 = vld [vmem:[#allocation10 + $0x18] sm:$0xff]  }
 0x163   :  { %1601 = vmatprep.subr.bf16.mxu0 %v1951_v0 }
 0x166   :  { %1602 = vmatpush3.bf16.msra.mxu0 %v1768_v5 }
 0x167   :  { %1603 = vmatprep.subr.bf16.mxu0 %v1951_v0 }
 0x16a   :  { %1604 = vmatpush3.bf16.msra.mxu0 %v1769_v6 }
 0x16b   :  { %1605 = vmatprep.subr.bf16.mxu0 %v1951_v0 }
 0x16e   :  { %1606 = vmatpush3.bf16.msra.mxu0 %v1770_v7 }
 0x16f   :  { %1631 = vmatprep.subr.bf16.mxu0 %v1951_v0 }
 0x224   :  { %v480_v60 = vpop.f32.mrb[8].mxu0 }
 0x225   :  { %v486_v61 = vadd.f32 %v480_v60, %v254_v59  ;;  %v1569_v62 = vpop.f32.mrb[9].mxu0  ;;  %v1793_v59 = vld [vmem:[#allocation9 + $0x30] sm:$0xff]   ;;  %v1794_v60 = vld [vmem:[#allocation9 + $0x38] sm:$0xff]  }
 0x226   :  { %v483_v63 = vpop.f32.mrb[10].mxu0  ;;  %v1803_v62 = vld [vmem:[#allocation9] sm:$0xff]  }
 0x227   :  { %1813 = vtanh.f32 %v486_v61  ;;  %v1570_v1 = vpop.f32.mrb[11].mxu0  ;;  %v1795_v61 = vld [vmem:[#allocation10] sm:$0xff]   ;;  %v1804_v63 = vld [vmem:[#allocation9 + $0x8] sm:$0xff]  }
 0x228   :  { %v1805_v1 = vld [vmem:[#allocation9 + $0x10] sm:$0xff]  }
 0x231   :  { %v2127_v2 = vpop.eup %1813 }
 0x232   :  { %v491_v3 = vpack.c.bf16 %v2127_v2, %v2127_v2 }
 0x234   :  { %1588 = vmatmul.mubr.bf16.vlgmr.msra.gmra.mrb[4].mxu1 %v491_v3  ;;  %v1806_v3 = vld [vmem:[#allocation9 + $0x18] sm:$0xff]  }
 0x235   :  { %1627 = vmatprep.mubr.msk.bf16.mxu1 %vm1952_vm0, %v1951_v0  ;;  %1612 = vmatpush3.bf16.msra.mxu1 %v1771_v8 }
 0x236   :  { %1613 = vmatprep.subr.bf16.mxu1 %v1951_v0 }
 0x239   :  { %1614 = vmatpush3.bf16.msra.mxu1 %v1772_v9 }
 0x23a   :  { %1615 = vmatprep.subr.bf16.mxu1 %v1951_v0 }
 0x23d   :  { %1616 = vmatpush3.bf16.msra.mxu1 %v1773_v10 }
 0x23e   :  { %1617 = vmatprep.subr.bf16.mxu1 %v1951_v0 }
 0x241   :  { %1618 = vmatpush3.bf16.msra.mxu1 %v1774_v11 }
 0x242   :  { %1619 = vmatprep.subr.bf16.mxu1 %v1951_v0 }
 0x245   :  { %1620 = vmatpush3.bf16.msra.mxu1 %v1775_v20  ;;  %v1807_v20 = vld [vmem:[#allocation9 + $0x20] sm:$0xff]  }
 0x246   :  { %1621 = vmatprep.subr.bf16.mxu1 %v1951_v0 }
 0x249   :  { %1622 = vmatpush3.bf16.msra.mxu1 %v1776_v21  ;;  %v1808_v21 = vld [vmem:[#allocation9 + $0x28] sm:$0xff]  }
 0x24a   :  { %1623 = vmatprep.subr.bf16.mxu1 %v1951_v0 }
 0x24d   :  { %1624 = vmatpush3.bf16.msra.mxu1 %v1777_v22  ;;  %v1809_v22 = vld [vmem:[#allocation9 + $0x30] sm:$0xff]  }
 0x24e   :  { %1625 = vmatprep.subr.bf16.mxu1 %v1951_v0 }
 0x251   :  { %1626 = vmatpush3.bf16.msra.mxu1 %v1778_v23  ;;  %v1810_v23 = vld [vmem:[#allocation9 + $0x38] sm:$0xff]  }
 0x252   :  { %1651 = vmatprep.subr.bf16.mxu1 %v1951_v0 }
 0x307   :  { %v590_v13 = vpop.f32.mrb[4].mxu1 }
 0x308   :  { %v596_v14 = vadd.f32 %v590_v13, %v255_v12  ;;  %v1589_v15 = vpop.f32.mrb[5].mxu1  ;;  %v1796_v12 = vld [vmem:[#allocation10 + $0x8] sm:$0xff]   ;;  %v1158_v13 = vpack.c.bf16 %v2127_v2, %v2104_v45  ;;  %v1802_v45 = vld [vmem:[#allocation10 + $0x38] sm:$0xff]  }
 0x309   :  { %v593_v16 = vpop.f32.mrb[6].mxu1  ;;  %v1799_v15 = vld [vmem:[#allocation10 + $0x20] sm:$0xff]  }
 0x30a   :  { %1815 = vtanh.f32 %v596_v14  ;;  %v1590_v17 = vpop.f32.mrb[7].mxu1  ;;  %v1797_v14 = vld [vmem:[#allocation10 + $0x10] sm:$0xff]   ;;  %v1800_v16 = vld [vmem:[#allocation10 + $0x28] sm:$0xff]  }
 0x30b   :  { %v1801_v17 = vld [vmem:[#allocation10 + $0x30] sm:$0xff]  }
 0x314   :  { %v2143_v18 = vpop.eup %1815 }
 0x315   :  { %v601_v19 = vpack.c.bf16 %v2143_v18, %v2143_v18 }
 0x317   :  { %1608 = vmatmul.mubr.bf16.vlgmr.msra.gmra.mrb[12].mxu0 %v601_v19 }
 0x318   :  { %1647 = vmatprep.mubr.msk.bf16.mxu0 %vm1952_vm0, %v1951_v0  ;;  %1632 = vmatpush3.bf16.msra.mxu0 %v1779_v24 }
 0x319   :  { %1633 = vmatprep.subr.bf16.mxu0 %v1951_v0 }
 0x31c   :  { %1634 = vmatpush3.bf16.msra.mxu0 %v1780_v25 }
 0x31d   :  { %1635 = vmatprep.subr.bf16.mxu0 %v1951_v0 }
 0x320   :  { %1636 = vmatpush3.bf16.msra.mxu0 %v1781_v26 }
 0x321   :  { %1637 = vmatprep.subr.bf16.mxu0 %v1951_v0 }
 0x324   :  { %1638 = vmatpush3.bf16.msra.mxu0 %v1782_v27 }
 0x325   :  { %1639 = vmatprep.subr.bf16.mxu0 %v1951_v0 }
 0x328   :  { %1640 = vmatpush3.bf16.msra.mxu0 %v1783_v37 }
 0x329   :  { %1641 = vmatprep.subr.bf16.mxu0 %v1951_v0 }
 0x32c   :  { %1642 = vmatpush3.bf16.msra.mxu0 %v1784_v38 }
 0x32d   :  { %1643 = vmatprep.subr.bf16.mxu0 %v1951_v0 }
 0x330   :  { %1644 = vmatpush3.bf16.msra.mxu0 %v1785_v39  ;;  %v260_v39 = vadd.f32 %v2114_v49, %v2097_v34 }
 0x331   :  { %1645 = vmatprep.subr.bf16.mxu0 %v1951_v0 }
 0x334   :  { %1646 = vmatpush3.bf16.msra.mxu0 %v1786_v40 }
 0x335   :  { %1671 = vmatprep.subr.bf16.mxu0 %v1951_v0 }
 0x3ea   :  { %v700_v29 = vpop.f32.mrb[12].mxu0 }
 0x3eb   :  { %v706_v30 = vadd.f32 %v700_v29, %v256_v28  ;;  %v1609_v31 = vpop.f32.mrb[13].mxu0 }
 0x3ec   :  { %v703_v32 = vpop.f32.mrb[14].mxu0  ;;  %v1402_v31 = vld [vmem:[%s2222_s5] ss:$0 sm:$0xff]  ;;  %s1954_s5 = smov [#allocation12]  }
 0x3ed   :  { %1817 = vtanh.f32 %v706_v30  ;;  %v1610_v33 = vpop.f32.mrb[15].mxu0  ;;  %s1311_s21 = sshll.u32 %s1954_s5, 4  ;;  %s1312_s21 = int_to_ptr.vmem [resolvable:$true] %s1311_s21 }
 0x3ee   :  { %s1915_s22 = scalar_lea.vmem %s1312_s21, 1024  ;;  %p1920_p5 = scmp.lt.s32.totalorder %s1312_s21, %s1312_s21 }
 0x3ef   :  { %p1916_p4 = scmp.ne.s32.totalorder %s1312_s21, %s1915_s22  ;;  %p1921_p6 = scmp.lt.s32.totalorder %s1915_s22, %s1915_s22 }
 0x3f1   :  { %p1922_p7 = por %p1921_p6, %p1920_p5 }
 0x3f3   :  { %p1923_p8 = pnand %p1922_p7, %p1916_p4 }
 0x3f7   :  { %v2159_v35 = vpop.eup %1817 }
 0x3f8   :  { %v711_v36 = vpack.c.bf16 %v2159_v35, %v2159_v35  ;;  %v1159_v2 = vpack.c.bf16 %v2159_v35, %v2143_v18  ;;  %v259_v18 = vadd.f32 %v2110_v47, %v2097_v34 }
 0x3fa   :  { %1628 = vmatmul.mubr.bf16.vlgmr.msra.gmra.mrb[8].mxu1 %v711_v36 }
 0x3fb   :  { %1667 = vmatprep.mubr.msk.bf16.mxu1 %vm1952_vm0, %v1951_v0  ;;  %1652 = vmatpush3.bf16.msra.mxu1 %v1787_v41 }
 0x3fc   :  { %1653 = vmatprep.subr.bf16.mxu1 %v1951_v0 }
 0x3ff   :  { %1654 = vmatpush3.bf16.msra.mxu1 %v1788_v42 }
 0x400   :  { %1655 = vmatprep.subr.bf16.mxu1 %v1951_v0 }
 0x403   :  { %1656 = vmatpush3.bf16.msra.mxu1 %v1789_v43 }
 0x404   :  { %1657 = vmatprep.subr.bf16.mxu1 %v1951_v0 }
 0x407   :  { %1658 = vmatpush3.bf16.msra.mxu1 %v1790_v44 }
 0x408   :  { %1659 = vmatprep.subr.bf16.mxu1 %v1951_v0 }
 0x40b   :  { %1660 = vmatpush3.bf16.msra.mxu1 %v1791_v58 }
 0x40c   :  { %1661 = vmatprep.subr.bf16.mxu1 %v1951_v0 }
 0x40f   :  { %1662 = vmatpush3.bf16.msra.mxu1 %v1792_v48 }
 0x410   :  { %1663 = vmatprep.subr.bf16.mxu1 %v1951_v0 }
 0x413   :  { %1664 = vmatpush3.bf16.msra.mxu1 %v1793_v59 }
 0x414   :  { %1665 = vmatprep.subr.bf16.mxu1 %v1951_v0 }
 0x417   :  { %1666 = vmatpush3.bf16.msra.mxu1 %v1794_v60 }
 0x418   :  { %1691 = vmatprep.subr.bf16.mxu1 %v1795_v61 }
 0x4cd   :  { %v810_v51 = vpop.f32.mrb[8].mxu1 }
 0x4ce   :  { %v816_v52 = vadd.f32 %v810_v51, %v257_v46  ;;  %v1629_v53 = vpop.f32.mrb[9].mxu1 }
 0x4cf   :  { %v813_v54 = vpop.f32.mrb[10].mxu1 }
 0x4d0   :  { %1819 = vtanh.f32 %v816_v52  ;;  %v1630_v55 = vpop.f32.mrb[11].mxu1 }
 0x4da   :  { %v2175_v56 = vpop.eup %1819 }
 0x4db   :  { %v821_v57 = vpack.c.bf16 %v2175_v56, %v2175_v56 }
 0x4dd   :  { %1648 = vmatmul.mubr.bf16.vlgmr.msra.gmra.mrb[16].mxu0 %v821_v57 }
 0x4de   :  { %1687 = vmatprep.mubr.msk.bf16.mxu0 %vm1952_vm0, %v1951_v0  ;;  %1672 = vmatpush3.bf16.msra.mxu0 %v1803_v62 }
 0x4df   :  { %1673 = vmatprep.subr.bf16.mxu0 %v1951_v0 }
 0x4e2   :  { %1674 = vmatpush3.bf16.msra.mxu0 %v1804_v63 }
 0x4e3   :  { %1675 = vmatprep.subr.bf16.mxu0 %v1951_v0 }
 0x4e6   :  { %1676 = vmatpush3.bf16.msra.mxu0 %v1805_v1 }
 0x4e7   :  { %1677 = vmatprep.subr.bf16.mxu0 %v1951_v0 }
 0x4ea   :  { %1678 = vmatpush3.bf16.msra.mxu0 %v1806_v3 }
 0x4eb   :  { %1679 = vmatprep.subr.bf16.mxu0 %v1951_v0 }
 0x4ee   :  { %1680 = vmatpush3.bf16.msra.mxu0 %v1807_v20 }
 0x4ef   :  { %1681 = vmatprep.subr.bf16.mxu0 %v1951_v0 }
 0x4f2   :  { %1682 = vmatpush3.bf16.msra.mxu0 %v1808_v21 }
 0x4f3   :  { %1683 = vmatprep.subr.bf16.mxu0 %v1951_v0 }
 0x4f6   :  { %1684 = vmatpush3.bf16.msra.mxu0 %v1809_v22 }
 0x4f7   :  { %1685 = vmatprep.subr.bf16.mxu0 %v1951_v0 }
 0x4fa   :  { %1686 = vmatpush3.bf16.msra.mxu0 %v1810_v23 }
 0x5b0   :  { %v920_v5 = vpop.f32.mrb[16].mxu0 }
 0x5b1   :  { %v926_v6 = vadd.f32 %v920_v5, %v258_v4  ;;  %v1649_v7 = vpop.f32.mrb[17].mxu0 }
 0x5b2   :  { %v923_v8 = vpop.f32.mrb[18].mxu0 }
 0x5b3   :  { %1821 = vtanh.f32 %v926_v6  ;;  %v1650_v9 = vpop.f32.mrb[19].mxu0 }
 0x5bd   :  { %v1822_v10 = vpop.eup %1821 }
 0x5be   :  { %v931_v11 = vpack.c.bf16 %v1822_v10, %v1822_v10  ;;  %v1160_v19 = vpack.c.bf16 %v1822_v10, %v2175_v56 }
 0x5c0   :  { %1668 = vmatmul.mubr.bf16.vlgmr.msra.gmra.mrb[12].mxu1 %v931_v11 }
 0x5c1   :  { %1692 = vmatpush3.bf16.msra.mxu1 %v1795_v61  ;;  %1707 = vmatprep.mubr.bf16.mxu1 %v1158_v13 }
 0x5c2   :  { %1693 = vmatprep.subr.bf16.mxu1 %v1796_v12 }
 0x5c5   :  { %1694 = vmatpush3.bf16.msra.mxu1 %v1796_v12 }
 0x5c6   :  { %1695 = vmatprep.subr.bf16.mxu1 %v1797_v14 }
 0x5c9   :  { %1696 = vmatpush3.bf16.msra.mxu1 %v1797_v14 }
 0x5ca   :  { %1697 = vmatprep.subr.bf16.mxu1 %v1798_v50 }
 0x5cd   :  { %1698 = vmatpush3.bf16.msra.mxu1 %v1798_v50 }
 0x5ce   :  { %1699 = vmatprep.subr.bf16.mxu1 %v1799_v15 }
 0x5d1   :  { %1700 = vmatpush3.bf16.msra.mxu1 %v1799_v15 }
 0x5d2   :  { %1701 = vmatprep.subr.bf16.mxu1 %v1800_v16 }
 0x5d5   :  { %1702 = vmatpush3.bf16.msra.mxu1 %v1800_v16 }
 0x5d6   :  { %1703 = vmatprep.subr.bf16.mxu1 %v1801_v17 }
 0x5d9   :  { %1704 = vmatpush3.bf16.msra.mxu1 %v1801_v17 }
 0x5da   :  { %1705 = vmatprep.subr.bf16.mxu1 %v1802_v45 }
 0x5dd   :  { %1706 = vmatpush3.bf16.msra.mxu1 %v1802_v45 }
 0x5e0   :  { %1708 = vmatmul.mubr.bf16.vlgmr.msra.gmra.mrb[16].mxu1 %v1159_v2 }
 0x5e1   :  { %1711 = vmatprep.mubr.bf16.mxu1 %v1160_v19 }
 0x693   :  { %v1030_v24 = vpop.f32.mrb[12].mxu1 }
 0x694   :  { %v1036_v25 = vadd.f32 %v1030_v24, %v259_v18  ;;  %v1669_v26 = vpop.f32.mrb[13].mxu1 }
 0x695   :  { %v1033_v27 = vpop.f32.mrb[14].mxu1 }
 0x696   :  { %1823 = vtanh.f32 %v1036_v25  ;;  %v1670_v28 = vpop.f32.mrb[15].mxu1 }
 0x6a0   :  { %v1824_v29 = vpop.eup %1823 }
 0x6a1   :  { %v1041_v30 = vpack.c.bf16 %v1824_v29, %v1824_v29 }
 0x6a3   :  { %1688 = vmatmul.mubr.bf16.vlgmr.msra.gmra.mrb[20].mxu0 %v1041_v30 }
 0x6b3   :  { %v1709_v32 = vpop.f32.mrb[16].mxu1 }
 0x6b4   :  { %v1276_v33 = vadd.f32 %v1709_v32, %v1402_v31  ;;  %v1267_v0 = vpop.f32.mrb[17].mxu1 }
 0x6b5   :  { %v1268_v35 = vadd.f32 %v1402_v31, %v1267_v0  ;;  %v1710_v36 = vpop.f32.mrb[18].mxu1 }
 0x6b6   :  { %1300 = vst [vmem:[#allocation12 + $0x10] sm:$0xff] %v1276_v33  ;;  %v1279_v47 = vadd.f32 %v1710_v36, %v1402_v31  ;;  %v1270_v37 = vpop.f32.mrb[19].mxu1 }
 0x6b7   :  { %1298 = vst [vmem:[#allocation12] sm:$0xff] %v1268_v35  ;;  %v1271_v38 = vadd.f32 %v1402_v31, %v1270_v37 }
 0x6b8   :  { %1301 = vst [vmem:[#allocation12 + $0x18] sm:$0xff] %v1279_v47 }
 0x6b9   :  { %1299 = vst [vmem:[#allocation12 + $0x8] sm:$0xff] %v1271_v38 }
 0x776   :  { %v1140_v40 = vpop.f32.mrb[20].mxu0 }
 0x777   :  { %v1146_v41 = vadd.f32 %v1140_v40, %v260_v39  ;;  %v1689_v42 = vpop.f32.mrb[21].mxu0 }
 0x778   :  { %v1143_v43 = vpop.f32.mrb[22].mxu0 }
 0x779   :  { %1825 = vtanh.f32 %v1146_v41  ;;  %v1690_v44 = vpop.f32.mrb[23].mxu0 }
 0x783   :  { %v1826_v46 = vpop.eup %1825 }
 0x784   :  { %v1161_v51 = vpack.c.bf16 %v1826_v46, %v1824_v29 }
 0x786   :  { %1712 = vmatmul.mubr.bf16.gmra.mrb[20].mxu1 %v1161_v51 }
 0x859   :  { %v1713_v52 = vpop.f32.mrb[20].mxu1 }
 0x85a   :  { %v1292_v53 = vadd.f32 %v1713_v52, %v1402_v31  ;;  %v1283_v54 = vpop.f32.mrb[21].mxu1 }
 0x85b   :  { %v1284_v55 = vadd.f32 %v1402_v31, %v1283_v54  ;;  %v1714_v56 = vpop.f32.mrb[22].mxu1 }
 0x85c   :  { %1304 = vst [vmem:[#allocation12 + $0x30] sm:$0xff] %v1292_v53  ;;  %v1295_v57 = vadd.f32 %v1714_v56, %v1402_v31  ;;  %v1286_v58 = vpop.f32.mrb[23].mxu1 }
 0x85d   :  { %1302 = vst [vmem:[#allocation12 + $0x20] sm:$0xff] %v1284_v55  ;;  %v1287_v34 = vadd.f32 %v1402_v31, %v1286_v58 }
 0x85e   :  { %1305 = vst [vmem:[#allocation12 + $0x38] sm:$0xff] %v1295_v57 }
 0x85f   :  { %1303 = vst [vmem:[#allocation12 + $0x28] sm:$0xff] %v1287_v34 }
 0x860   :  { %1926 = shalt.err (!%p1923_p8)
}
 0x861   :  { %s1927_s26 = scalar_lea.hbm %s2223_s6, 1024 }
 0x862   :  { %p1928_p9 = scmp.ne.s32.totalorder %s2223_s6, %s1927_s26  ;;  %p1931_p10 = scmp.lt.u32.totalorder %s1927_s26, %s2223_s6 }
 0x864   :  { %p1933_p11 = pnand %p1931_p10, %p1928_p9 }
 0x866   :  { %1936 = shalt.err (!%p1933_p11)
}
 0x867   :  { %s1955_s7 = smov 128   ;;  %s1956_s8 = smov 8  }
 0x868   :  { %1317 = dma.vmem_to_hbm [thread:$0]  %s1312_s21, 1024, %s2223_s6, [#allocation6], %s1955_s7, %s1955_s7, %s1956_s8  }
 0x869   :  { %1943 = dma.done.wait [#allocation6], 1024  }
 0x86a   :  { %1944 = vsyncadd [#allocation6], 4294966272 }
 0x86b   :  { %1321 = vsyncpa [#allocation5], 1 }
 0x86c   :  { %1322 = vsyncpa [#allocation8], 1 }
 0x86d   :  { %1323 = vsyncpa [#allocation11], 1 }
 0x86e   :  { %1324 = vsyncpa [#allocation6], 1 }

</bundles_post_ra>
